<compile_context>
chip_gen: v5e
topology: v5e:2x2
jax: 0.10.0
libtpu: 0.0.40
codegen_flags: <defaults>
</compile_context>

<pallas_src>
import functools

import jax
import jax.numpy as jnp
from jax import lax
from jax.experimental import pallas as pl
from jax.experimental.pallas import tpu as pltpu

_LANES = 128
_SUBLANES = 8


def _num_tc_splits():
    """Best-effort TensorCores per device: 1 on v5e/v6e, 2 on megacore parts."""
    try:
        kind = jax.devices()[0].device_kind.lower()
    except Exception:
        return 2
    if "v5e" in kind or "v5 lite" in kind or "v5lite" in kind or "v6" in kind:
        return 1
    return 2


def _mse_kernel(r_ref, y_ref, o_ref, *, n_rows, blocks_per_split, block_rows,
                chunk_rows):
    c = pl.program_id(0)   # parallel split (maps to a TensorCore on megacore)
    i = pl.program_id(1)   # sequential block index within the split

    @pl.when(i == 0)
    def _():
        o_ref[...] = jnp.zeros_like(o_ref)

    block_id = c * blocks_per_split + i
    block_row0 = block_id * block_rows          # row units -> int32-safe
    n_chunks = block_rows // chunk_rows         # static
    unroll = True if n_chunks <= 4 else 2

    def sq_diff(r, y):
        rf = r.astype(jnp.float32)
        yf = jnp.maximum(y.astype(jnp.float32), 0.0)       # y[y < 0] = 0
        # sigmoid(x) == 0.5 * (tanh(0.5 x) + 1): one EUP push per vreg.
        # TODO(synk): on v7x (EUP-bound regime) a bf16 tanh would halve EUP
        # pushes; kept f32 here to preserve accuracy on all generations.
        p = 0.5 * (jnp.tanh(0.5 * rf) + 1.0)
        d = p - yf
        return d * d

    zero_acc = jnp.zeros((_SUBLANES, _LANES), jnp.float32)
    is_full = block_row0 + block_rows <= n_rows

    @pl.when(is_full)
    def _():
        # Fast path: block entirely inside the valid range, no masking.
        def body(t, acc):
            r0 = pl.multiple_of(t * chunk_rows, chunk_rows)
            sq = sq_diff(r_ref[pl.ds(r0, chunk_rows), :],
                         y_ref[pl.ds(r0, chunk_rows), :])
            return acc + sq.reshape(-1, _SUBLANES, _LANES).sum(axis=0)

        acc = lax.fori_loop(0, n_chunks, body, zero_acc, unroll=unroll)
        o_ref[...] += acc

    @pl.when(jnp.logical_not(is_full))
    def _():
        # Tail (or phantom) block: row-based mask.  Select (NOT multiply) so
        # garbage rows left by the clipped DMA cannot propagate NaN/Inf.
        valid_rows = jnp.clip(n_rows - block_row0, 0, block_rows)
        row_in_chunk = lax.broadcasted_iota(jnp.int32, (chunk_rows, _LANES), 0)

        def body(t, acc):
            r0 = pl.multiple_of(t * chunk_rows, chunk_rows)
            sq = sq_diff(r_ref[pl.ds(r0, chunk_rows), :],
                         y_ref[pl.ds(r0, chunk_rows), :])
            valid_in_chunk = jnp.clip(valid_rows - t * chunk_rows, 0, chunk_rows)
            sq = jnp.where(row_in_chunk < valid_in_chunk, sq, 0.0)
            return acc + sq.reshape(-1, _SUBLANES, _LANES).sum(axis=0)

        acc = lax.fori_loop(0, n_chunks, body, zero_acc, unroll=unroll)
        o_ref[...] += acc


def mse_loss_pallas(results, labels, *, block_rows=4096, chunk_rows=256):
    assert results.shape == labels.shape
    assert block_rows % chunk_rows == 0 and chunk_rows % _SUBLANES == 0
    lanes = _LANES
    total_n = int(results.size)

    # Flatten in the native dtype (bf16 inputs keep half the HBM traffic; the
    # upcast to f32 happens for free on the VPU inside the kernel).
    r_flat = jnp.ravel(results)
    y_flat = jnp.ravel(labels)

    n_rows = total_n // lanes
    aligned_n = n_rows * lanes
    rem = total_n - aligned_n

    # <128-element remainder handled in plain JAX: avoids a full-tensor
    # jnp.pad copy of BOTH inputs just to append a few elements.
    if rem:
        r_t = r_flat[aligned_n:].astype(jnp.float32)
        y_t = jnp.maximum(y_flat[aligned_n:].astype(jnp.float32), 0.0)
        p_t = 0.5 * (jnp.tanh(0.5 * r_t) + 1.0)
        tail_sum = jnp.sum((p_t - y_t) ** 2)
    else:
        tail_sum = jnp.float32(0.0)

    if n_rows == 0:   # tiny input, nothing for the kernel to do
        return tail_sum / jnp.float32(total_n)

    r2d = (r_flat[:aligned_n] if rem else r_flat).reshape(n_rows, lanes)
    y2d = (y_flat[:aligned_n] if rem else y_flat).reshape(n_rows, lanes)

    # Block sizing: big DMA blocks, kept a multiple of chunk_rows so the
    # in-kernel chunk loop tiles exactly; shrink for small inputs.
    if n_rows <= chunk_rows:
        block_rows = _SUBLANES * pl.cdiv(n_rows, _SUBLANES)
        chunk_rows = block_rows
    else:
        block_rows = min(block_rows, chunk_rows * pl.cdiv(n_rows, chunk_rows))

    n_blocks = pl.cdiv(n_rows, block_rows)
    num_splits = _num_tc_splits() if n_blocks >= 2 else 1
    blocks_per_split = pl.cdiv(n_blocks, num_splits)

    def in_index(c, i):
        # Clamp phantom blocks onto a valid block; the kernel masks their
        # contribution to exactly zero.
        return (jnp.minimum(c * blocks_per_split + i, n_blocks - 1), 0)

    kernel = functools.partial(
        _mse_kernel,
        n_rows=n_rows,
        blocks_per_split=blocks_per_split,
        block_rows=block_rows,
        chunk_rows=chunk_rows,
    )

    itemsize = max(jnp.dtype(results.dtype).itemsize,
                   jnp.dtype(labels.dtype).itemsize)
    block_bytes = block_rows * lanes * itemsize
    # 2 inputs x 2 pipeline buffers + output tiles + headroom; fits every
    # generation's scoped-VMEM default (16 MiB v5e, 32 MiB v6e/v7x).
    vmem_limit = int(min(max(4 * block_bytes + (2 << 20), 16 << 20), 32 << 20))

    partials = pl.pallas_call(
        kernel,
        out_shape=jax.ShapeDtypeStruct((num_splits * _SUBLANES, lanes),
                                       jnp.float32),
        grid_spec=pltpu.PrefetchScalarGridSpec(
            num_scalar_prefetch=0,
            grid=(num_splits, blocks_per_split),
            in_specs=[
                pl.BlockSpec((block_rows, lanes), in_index),
                pl.BlockSpec((block_rows, lanes), in_index),
            ],
            # Per-split (8,128) partial-sum tile, resident across the i axis.
            out_specs=pl.BlockSpec((_SUBLANES, lanes), lambda c, i: (c, 0)),
        ),
        compiler_params=pltpu.CompilerParams(
            dimension_semantics=("parallel", "arbitrary"),
            vmem_limit_bytes=vmem_limit,
        ),
    )(r2d, y2d)

    # Single cross-lane reduce + divide, once, outside the hot loop.
    return (jnp.sum(partials) + tail_sum) / jnp.float32(total_n)


def mse_loss_ref(results, labels):
    y = jnp.maximum(labels.astype(jnp.float32), 0.0)
    p = jax.nn.sigmoid(results.astype(jnp.float32))
    return jnp.mean((p - y) ** 2)


if __name__ == "__main__":
    key = jax.random.PRNGKey(0)
    k1, k2, k3, k4, k5, k6 = jax.random.split(key, 6)

    # Small shape consistent with an image-classification watermark head:
    # logits/labels of shape [batch, channels, H, W].
    shape = (2, 4, 16, 16)
    results = jax.random.normal(k1, shape, dtype=jnp.float32)
    labels = jax.random.normal(k2, shape, dtype=jnp.float32)  # has negatives
    loss = jax.block_until_ready(mse_loss_pallas(results, labels))
    ref = mse_loss_ref(results, labels)
    assert jnp.allclose(loss, ref, rtol=1e-5, atol=1e-5), (loss, ref)

    # Odd size: exercises the wrapper-side <128 tail + masked last row.
    shape2 = (3, 4, 15, 17)
    r2 = jax.random.normal(k3, shape2, dtype=jnp.float32)
    y2 = jax.random.normal(k4, shape2, dtype=jnp.float32)
    loss2 = jax.block_until_ready(mse_loss_pallas(r2, y2))
    ref2 = mse_loss_ref(r2, y2)
    assert jnp.allclose(loss2, ref2, rtol=1e-5, atol=1e-5), (loss2, ref2)

    # Larger shape: exercises the chunked inner loop, multi-block grid, the
    # masked tail block and (on megacore parts) the 2-way split.
    shape3 = (8, 8, 96, 96)
    r3 = jax.random.normal(k5, shape3, dtype=jnp.float32)
    y3 = jax.random.normal(k6, shape3, dtype=jnp.float32)
    loss3 = jax.block_until_ready(mse_loss_pallas(r3, y3))
    ref3 = mse_loss_ref(r3, y3)
    assert jnp.allclose(loss3, ref3, rtol=1e-5, atol=1e-5), (loss3, ref3)

    print("KERNEL_OK")
</pallas_src>

<mosaic_0001>
module attributes {stable_mosaic.version = 11 : i64} {
  func.func @_mse_kernel(%arg0: i32, %arg1: i32, %arg2: memref<16x128xf32, #tpu.memory_space<vmem>>, %arg3: memref<16x128xf32, #tpu.memory_space<vmem>>, %arg4: memref<8x128xf32, #tpu.memory_space<vmem>>) attributes {dimension_semantics = [#tpu.dimension_semantics<parallel>, #tpu.dimension_semantics<arbitrary>], iteration_bounds = array<i64: 1, 1>, scalar_prefetch = 0 : i64, scratch_operands = 0 : i64, tpu.core_type = #tpu.core_type<tc>, window_params = [{transform_indices = @transform_0, window_bounds = array<i64: 16, 128>}, {transform_indices = @transform_1, window_bounds = array<i64: 16, 128>}, {transform_indices = @transform_2, window_bounds = array<i64: 8, 128>}]} {
    %c0_i32 = arith.constant 0 : i32
    %0 = arith.cmpi eq, %arg1, %c0_i32 : i32
    %1 = arith.extui %0 : i1 to i32
    %c0_i32_0 = arith.constant 0 : i32
    %2 = arith.cmpi ne, %1, %c0_i32_0 : i32
    scf.if %2 {
      %cst_5 = arith.constant 0.000000e+00 : f32
      %14 = vector.broadcast %cst_5 : f32 to vector<8x128xf32>
      %c0 = arith.constant 0 : index
      %c0_6 = arith.constant 0 : index
      %15 = vector.load %arg4[%c0, %c0_6] : memref<8x128xf32, #tpu.memory_space<vmem>>, vector<8x128xf32>
      tpu.vector_store %arg4[%c0, %c0_6], %14 {strides = array<i32>} : memref<8x128xf32, #tpu.memory_space<vmem>>, vector<8x128xf32>,
    } else {
    }
    %c1_i32 = arith.constant 1 : i32
    %3 = arith.muli %arg0, %c1_i32 : i32
    %4 = arith.addi %3, %arg1 : i32
    %c16_i32 = arith.constant 16 : i32
    %5 = arith.muli %4, %c16_i32 : i32
    %cst = arith.constant 0.000000e+00 : f32
    %6 = vector.broadcast %cst : f32 to vector<8x128xf32>
    %c16_i32_1 = arith.constant 16 : i32
    %7 = arith.addi %5, %c16_i32_1 : i32
    %c16_i32_2 = arith.constant 16 : i32
    %8 = arith.cmpi sle, %7, %c16_i32_2 : i32
    %9 = arith.extui %8 : i1 to i32
    %c0_i32_3 = arith.constant 0 : i32
    %10 = arith.cmpi ne, %9, %c0_i32_3 : i32
    scf.if %10 {
      %c0_i32_5 = arith.constant 0 : i32
      %c16_i32_6 = arith.constant 16 : i32
      %14 = arith.muli %c0_i32_5, %c16_i32_6 : i32
      %15 = tpu.assume_multiple %14, 16 : i32
      %16 = arith.index_cast %15 : i32 to index
      %c0 = arith.constant 0 : index
      %17 = vector.load %arg2[%16, %c0] : memref<16x128xf32, #tpu.memory_space<vmem>>, vector<16x128xf32>
      %18 = arith.index_cast %15 : i32 to index
      %c0_7 = arith.constant 0 : index
      %19 = vector.load %arg3[%18, %c0_7] : memref<16x128xf32, #tpu.memory_space<vmem>>, vector<16x128xf32>
      %cst_8 = arith.constant 0.000000e+00 : f32
      %20 = vector.broadcast %cst_8 : f32 to vector<16x128xf32>
      %21 = arith.maximumf %19, %20 : vector<16x128xf32>
      %cst_9 = arith.constant 5.000000e-01 : f32
      %22 = vector.broadcast %cst_9 : f32 to vector<16x128xf32>
      %23 = arith.mulf %22, %17 : vector<16x128xf32>
      %24 = math.tanh %23 : vector<16x128xf32>
      %cst_10 = arith.constant 1.000000e+00 : f32
      %25 = vector.broadcast %cst_10 : f32 to vector<16x128xf32>
      %26 = arith.addf %24, %25 : vector<16x128xf32>
      %cst_11 = arith.constant 5.000000e-01 : f32
      %27 = vector.broadcast %cst_11 : f32 to vector<16x128xf32>
      %28 = arith.mulf %27, %26 : vector<16x128xf32>
      %29 = arith.subf %28, %21 : vector<16x128xf32>
      %30 = arith.mulf %29, %29 : vector<16x128xf32>
      %31 = vector.shape_cast %30 : vector<16x128xf32> to vector<2x8x128xf32>
      %cst_12 = arith.constant dense<0.000000e+00> : vector<8x128xf32>
      %32 = vector.multi_reduction <add>, %31, %cst_12 [0] : vector<2x8x128xf32> to vector<8x128xf32>
      %33 = arith.addf %6, %32 : vector<8x128xf32>
      %c1_i32_13 = arith.constant 1 : i32
      %c0_14 = arith.constant 0 : index
      %c0_15 = arith.constant 0 : index
      %34 = vector.load %arg4[%c0_14, %c0_15] : memref<8x128xf32, #tpu.memory_space<vmem>>, vector<8x128xf32>
      %35 = arith.addf %34, %33 : vector<8x128xf32>
      %c0_16 = arith.constant 0 : index
      %c0_17 = arith.constant 0 : index
      %36 = vector.load %arg4[%c0_16, %c0_17] : memref<8x128xf32, #tpu.memory_space<vmem>>, vector<8x128xf32>
      tpu.vector_store %arg4[%c0_16, %c0_17], %35 {strides = array<i32>} : memref<8x128xf32, #tpu.memory_space<vmem>>, vector<8x128xf32>,
    } else {
    }
    %true = arith.constant true
    %11 = arith.xori %8, %true : i1
    %12 = arith.extui %11 : i1 to i32
    %c0_i32_4 = arith.constant 0 : i32
    %13 = arith.cmpi ne, %12, %c0_i32_4 : i32
    scf.if %13 {
      %c16_i32_5 = arith.constant 16 : i32
      %14 = arith.subi %c16_i32_5, %5 : i32
      %c0_i32_6 = arith.constant 0 : i32
      %c16_i32_7 = arith.constant 16 : i32
      %15 = arith.maxsi %c0_i32_6, %14 : i32
      %16 = arith.minsi %c16_i32_7, %15 : i32
      %17 = tpu.iota {dimensions = array<i32: 0>} : vector<16x128xi32>
      %c0_i32_8 = arith.constant 0 : i32
      %c16_i32_9 = arith.constant 16 : i32
      %18 = arith.muli %c0_i32_8, %c16_i32_9 : i32
      %19 = tpu.assume_multiple %18, 16 : i32
      %20 = arith.index_cast %19 : i32 to index
      %c0 = arith.constant 0 : index
      %21 = vector.load %arg2[%20, %c0] : memref<16x128xf32, #tpu.memory_space<vmem>>, vector<16x128xf32>
      %22 = arith.index_cast %19 : i32 to index
      %c0_10 = arith.constant 0 : index
      %23 = vector.load %arg3[%22, %c0_10] : memref<16x128xf32, #tpu.memory_space<vmem>>, vector<16x128xf32>
      %cst_11 = arith.constant 0.000000e+00 : f32
      %24 = vector.broadcast %cst_11 : f32 to vector<16x128xf32>
      %25 = arith.maximumf %23, %24 : vector<16x128xf32>
      %cst_12 = arith.constant 5.000000e-01 : f32
      %26 = vector.broadcast %cst_12 : f32 to vector<16x128xf32>
      %27 = arith.mulf %26, %21 : vector<16x128xf32>
      %28 = math.tanh %27 : vector<16x128xf32>
      %cst_13 = arith.constant 1.000000e+00 : f32
      %29 = vector.broadcast %cst_13 : f32 to vector<16x128xf32>
      %30 = arith.addf %28, %29 : vector<16x128xf32>
      %cst_14 = arith.constant 5.000000e-01 : f32
      %31 = vector.broadcast %cst_14 : f32 to vector<16x128xf32>
      %32 = arith.mulf %31, %30 : vector<16x128xf32>
      %33 = arith.subf %32, %25 : vector<16x128xf32>
      %34 = arith.mulf %33, %33 : vector<16x128xf32>
      %c16_i32_15 = arith.constant 16 : i32
      %35 = arith.muli %c0_i32_8, %c16_i32_15 : i32
      %36 = arith.subi %16, %35 : i32
      %c0_i32_16 = arith.constant 0 : i32
      %c16_i32_17 = arith.constant 16 : i32
      %37 = arith.maxsi %c0_i32_16, %36 : i32
      %38 = arith.minsi %c16_i32_17, %37 : i32
      %39 = vector.broadcast %38 : i32 to vector<16x128xi32>
      %40 = arith.cmpi slt, %17, %39 : vector<16x128xi32>
      %cst_18 = arith.constant 0.000000e+00 : f32
      %41 = vector.broadcast %cst_18 : f32 to vector<16x128xf32>
      %42 = arith.select %40, %34, %41 : vector<16x128xi1>, vector<16x128xf32>
      %43 = vector.shape_cast %42 : vector<16x128xf32> to vector<2x8x128xf32>
      %cst_19 = arith.constant dense<0.000000e+00> : vector<8x128xf32>
      %44 = vector.multi_reduction <add>, %43, %cst_19 [0] : vector<2x8x128xf32> to vector<8x128xf32>
      %45 = arith.addf %6, %44 : vector<8x128xf32>
      %c1_i32_20 = arith.constant 1 : i32
      %c0_21 = arith.constant 0 : index
      %c0_22 = arith.constant 0 : index
      %46 = vector.load %arg4[%c0_21, %c0_22] : memref<8x128xf32, #tpu.memory_space<vmem>>, vector<8x128xf32>
      %47 = arith.addf %46, %45 : vector<8x128xf32>
      %c0_23 = arith.constant 0 : index
      %c0_24 = arith.constant 0 : index
      %48 = vector.load %arg4[%c0_23, %c0_24] : memref<8x128xf32, #tpu.memory_space<vmem>>, vector<8x128xf32>
      tpu.vector_store %arg4[%c0_23, %c0_24], %47 {strides = array<i32>} : memref<8x128xf32, #tpu.memory_space<vmem>>, vector<8x128xf32>,
    } else {
    }
    return
  }
  func.func @transform_0(%arg0: i32, %arg1: i32) -> (i32, i32) {
    %c1_i32 = arith.constant 1 : i32
    %0 = arith.muli %arg0, %c1_i32 : i32
    %1 = arith.addi %0, %arg1 : i32
    %c0_i32 = arith.constant 0 : i32
    %2 = arith.minsi %1, %c0_i32 : i32
    %c0_i32_0 = arith.constant 0 : i32
    %c0_i32_1 = arith.constant 0 : i32
    return %2, %c0_i32_0 : i32, i32
  }
  func.func @transform_1(%arg0: i32, %arg1: i32) -> (i32, i32) {
    %c1_i32 = arith.constant 1 : i32
    %0 = arith.muli %arg0, %c1_i32 : i32
    %1 = arith.addi %0, %arg1 : i32
    %c0_i32 = arith.constant 0 : i32
    %2 = arith.minsi %1, %c0_i32 : i32
    %c0_i32_0 = arith.constant 0 : i32
    %c0_i32_1 = arith.constant 0 : i32
    return %2, %c0_i32_0 : i32, i32
  }
  func.func @transform_2(%arg0: i32, %arg1: i32) -> (i32, i32) {
    %c0_i32 = arith.constant 0 : i32
    %c0_i32_0 = arith.constant 0 : i32
    return %arg0, %c0_i32 : i32, i32
  }
}

</mosaic_0001>

<bundles_post_ra>
// kernel: tpu_custom_call.1
= control target key start
LH: loop header
LB: loop body
LE: loop exit
PB: predicated region body
PF: predicated region fallthrough
CT: control target
= control target key end

     0   :  { %7 = vsyncpa [#allocation3], 0  ;;  %s282_s0 = inlined_call_operand.hbm [shape: f32[16,128], index: 0, kind: input, shape index: {}]   ;;  %s283_s1 = inlined_call_operand.hbm [shape: f32[16,128], index: 1, kind: input, shape index: {}]   ;;  %s284_s2 = inlined_call_operand.hbm [shape: f32[8,128], index: 2, kind: output, shape index: {}]  }
   0x1   :  { %8 = vsyncpa [#allocation6], 0 }
   0x2   :  { %9 = vsyncpa [#allocation4], 0  ;;  %s20_s11 = sshll.u32 %s282_s0, 4  ;;  %s253_s12 = smov [#allocation2]   ;;  %s21_s11 = int_to_ptr.hbm [resolvable:$true] %s20_s11 }
   0x3   :  { %s22_s13 = sshll.u32 %s253_s12, 4  ;;  %s39_s16 = sshll.u32 %s283_s1, 4  ;;  %s23_s13 = int_to_ptr.vmem [resolvable:$true] %s22_s13  ;;  %s40_s16 = int_to_ptr.hbm [resolvable:$true] %s39_s16 }
   0x4   :  { %s254_s17 = smov 128   ;;  %s255_s18 = smov 8  }
   0x5   :  { %28 = dma.hbm_to_vmem [thread:$0]  %s21_s11, 256, %s23_s13, [#allocation3], %s254_s17, %s254_s17, %s255_s18  }
   0x6   :  { %s256_s19 = smov [#allocation5]  }
   0x7   :  { %s41_s20 = sshll.u32 %s256_s19, 4  ;;  %s42_s20 = int_to_ptr.vmem [resolvable:$true] %s41_s20 }
   0x8   :  { %47 = dma.hbm_to_vmem [thread:$0]  %s40_s16, 256, %s42_s20, [#allocation6], %s254_s17, %s254_s17, %s255_s18  }
   0x9   :  { %247 = dma.done.wait [#allocation3], 256  }
   0xa   :  { %248 = vsyncadd [#allocation3], 4294967040 }
   0xb   :  { %249 = dma.done.wait [#allocation6], 256  }
   0xc   :  { %250 = vsyncadd [#allocation6], 4294967040  ;;  %v76_v0 = vld [vmem:[#allocation2] sm:$0xff]  ;;  %v77_v1 = vld [vmem:[#allocation2 + $0x8] sm:$0xff]  ;;  %s257_s0 = smov [#allocation7]   ;;  %s150_s23 = sshll.u32 %s284_s2, 4  ;;  %s151_s23 = int_to_ptr.hbm [resolvable:$true] %s150_s23 }
   0xd   :  { %v82_v2 = vmul.f32 0.5, %v76_v0  ;;  %v83_v3 = vmul.f32 0.5, %v77_v1  ;;  %v78_v4 = vld [vmem:[#allocation5] sm:$0xff]  ;;  %v79_v5 = vld [vmem:[#allocation5 + $0x8] sm:$0xff]  ;;  %s148_s1 = sshll.u32 %s257_s0, 4  ;;  %s149_s1 = int_to_ptr.vmem [resolvable:$true] %s148_s1 }
   0xe   :  { %v80_v8 = vmax.f32 %v78_v4, 0.0  ;;  %v81_v10 = vmax.f32 %v79_v5, 0.0 }
   0xf   :  { %171 = vtanh.f32 %v82_v2 }
  0x10   :  { %173 = vtanh.f32 %v83_v3 }
  0x15   :  { %v172_v6 = vpop.eup %171 }
  0x16   :  { %v174_v7 = vpop.eup %173  ;;  %v86_v9 = vadd.f32 1.0, %v172_v6 }
  0x17   :  { %v87_v11 = vadd.f32 1.0, %v174_v7 }
  0x18   :  { %v88_v12 = vmul.f32 0.5, %v86_v9 }
  0x19   :  { %v89_v13 = vmul.f32 0.5, %v87_v11 }
  0x1a   :  { %v90_v14 = vsub.f32 %v88_v12, %v80_v8 }
  0x1b   :  { %v91_v15 = vsub.f32 %v89_v13, %v81_v10 }
  0x1c   :  { %v92_v16 = vmul.f32 %v90_v14, %v90_v14 }
  0x1d   :  { %v93_v17 = vmul.f32 %v91_v15, %v91_v15 }
  0x1f   :  { %v94_v18 = vadd.f32 %v93_v17, %v92_v16 }
  0x21   :  { %98 = vst [vmem:[#allocation7] sm:$0xff] %v94_v18 }
  0x22   :  { %153 = dma.vmem_to_hbm [thread:$0]  %s149_s1, 128, %s151_s23, [#allocation4]  }
  0x23   :  { %251 = dma.done.wait [#allocation4], 128  }
  0x24   :  { %252 = vsyncadd [#allocation4], 4294967168 }
  0x25   :  { %158 = vsyncpa [#allocation3], 1 }
  0x26   :  { %159 = vsyncpa [#allocation6], 1 }
  0x27   :  { %160 = vsyncpa [#allocation4], 1 }

</bundles_post_ra>
